<compile_context>
chip_gen: v7x
topology: tpu7x:2x2x1
jax: 0.10.0
libtpu: 0.0.40
codegen_flags: <defaults>
</compile_context>

<pallas_src>
import functools

import jax
import jax.numpy as jnp
from jax import lax
from jax.experimental import pallas as pl
from jax.experimental.pallas import tpu as pltpu

H1, H2, NNUM = 500, 100, 2          # logical sizes from the PyTorch module
H1P, H2P, NP = 512, 128, 128        # lane / MXU padded sizes
T = 10.0
_MIB = 1024 * 1024


def _round_up(x, m):
    return (x + m - 1) // m * m


def _cdiv(a, b):
    return -(-a // b)


# --------------------------------------------------------------------------
# Feature / hardware probes
# --------------------------------------------------------------------------
def _probe_single_buffer():
    """Narrow feature check: does this jax expose BlockSpec(pipeline_mode=...)?"""
    try:
        pl.BlockSpec((8, 128), lambda i: (0, 0), pipeline_mode=pl.Buffered(1))
        return True
    except (AttributeError, TypeError):
        return False


_HAS_BUFFERED1 = _probe_single_buffer()


@functools.lru_cache(maxsize=None)
def _vmem_limit_bytes():
    """Generation-aware scoped-VMEM limit (v5e/v6e: 128 MiB phys, v7x: 64 MiB)."""
    try:
        cap = int(pltpu.get_tpu_info().vmem_capacity_bytes)
    except Exception:  # hardware query unavailable -> conservative known-good default
        return 32 * _MIB
    if cap >= 128 * _MIB:            # v5e / v6e
        return 64 * _MIB
    # v7x (64 MiB physical): leave headroom for compiler scratch.
    return min(48 * _MIB, max(cap - 16 * _MIB, 32 * _MIB))


# --------------------------------------------------------------------------
# Shared MLP math (used by the fused fast path and the phase-1 kernel)
# --------------------------------------------------------------------------
def _attention_a0(x_f32, k_f32, w1a, w1b, b1, w2, b2, w3, b3):
    """Per-row softmax weight a0 (closed form, [rows, 1] f32)."""
    xb = x_f32.astype(jnp.bfloat16)
    kb = k_f32.astype(jnp.bfloat16)
    # fc1 on concat([x, k], 1) in split-weight form (no explicit concat).
    h1 = (jnp.dot(xb, w1a, preferred_element_type=jnp.float32)
          + jnp.dot(kb, w1b, preferred_element_type=jnp.float32) + b1)
    h1 = jnp.maximum(h1, 0.0)                                          # [r, 512]
    h2 = jnp.dot(h1.astype(jnp.bfloat16), w2,
                 preferred_element_type=jnp.float32) + b2
    h2 = jnp.maximum(h2, 0.0)                                          # [r, 128]
    logits = jnp.dot(h2.astype(jnp.bfloat16), w3,
                     preferred_element_type=jnp.float32) + b3          # [r, 128]
    s0 = jax.nn.sigmoid(logits[:, 0:1])
    s1 = jax.nn.sigmoid(logits[:, 1:2])
    # softmax over two entries == sigmoid of the scaled difference (EUP, no XLU).
    return jax.nn.sigmoid((s0 - s1) * (1.0 / T))                       # [r, 1]


def _const_spec(shape, single_buffer):
    idx = lambda *g: (0,) * len(shape)
    if single_buffer and _HAS_BUFFERED1:
        # Constant block across the whole grid -> no double buffer needed.
        return pl.BlockSpec(shape, idx, pipeline_mode=pl.Buffered(1))
    return pl.BlockSpec(shape, idx)


# --------------------------------------------------------------------------
# Fused fast path: whole problem resident in VMEM, one pallas_call
# --------------------------------------------------------------------------
def _fused_kernel(x_ref, k_ref, w1a_ref, w1b_ref, b1_ref, w2_ref, b2_ref,
                  w3_ref, b3_ref, o_ref, *, batch):
    x = x_ref[...]
    k = k_ref[...]
    a0 = _attention_a0(x, k, w1a_ref[...], w1b_ref[...], b1_ref[...],
                       w2_ref[...], b2_ref[...], w3_ref[...], b3_ref[...])
    w0 = jnp.sum(a0, axis=0, keepdims=True) * (1.0 / batch)            # [1, 1]
    w1 = 1.0 - w0
    o_ref[...] = (w0 * x + w1 * k).astype(o_ref.dtype)


def _fused_call(x, k, kparams, vmem_limit):
    B, D = x.shape
    kernel = functools.partial(_fused_kernel, batch=B)
    full = lambda a: pl.BlockSpec(a.shape, lambda i, _nd=a.ndim: (0,) * _nd)
    return pl.pallas_call(
        kernel,
        out_shape=jax.ShapeDtypeStruct((B, D), x.dtype),
        grid_spec=pltpu.PrefetchScalarGridSpec(
            num_scalar_prefetch=0,
            grid=(1,),
            in_specs=[full(x), full(k)] + [full(a) for a in kparams],
            out_specs=pl.BlockSpec((B, D), lambda i: (0, 0)),
        ),
        compiler_params=pltpu.CompilerParams(
            dimension_semantics=("arbitrary",),
            vmem_limit_bytes=vmem_limit,
        ),
    )(x, k, *kparams)


# --------------------------------------------------------------------------
# Phase 1: MLP sweep -> per-split partial sums of a0 (dual-TC friendly)
# --------------------------------------------------------------------------
def _attn_weights_kernel(x_ref, k_ref, w1a_ref, w1b_ref, b1_ref, w2_ref,
                         b2_ref, w3_ref, b3_ref, o_ref, acc_ref, *,
                         batch, tile_rows, steps_per_split, masked):
    step = pl.program_id(1)

    @pl.when(step == 0)
    def _():
        acc_ref[...] = jnp.zeros_like(acc_ref)

    a0 = _attention_a0(x_ref[...], k_ref[...], w1a_ref[...], w1b_ref[...],
                       b1_ref[...], w2_ref[...], b2_ref[...], w3_ref[...],
                       b3_ref[...])                                    # [TB, 1]

    if masked:  # static: only when the batch was zero-padded to the grid
        tile_idx = pl.program_id(0) * steps_per_split + step
        row = tile_idx * tile_rows + lax.broadcasted_iota(
            jnp.int32, (tile_rows, 1), 0)
        a0 = jnp.where(row < batch, a0, 0.0)

    acc_ref[...] += jnp.sum(a0, axis=0, keepdims=True)                 # [1, 1]

    @pl.when(step == steps_per_split - 1)
    def _():
        # one lane-dense partial-sum row per split (combined in the wrapper)
        o_ref[...] = pl.broadcast_to(acc_ref[...], (1, 128))


def _attn_partial_sums(x_p, k_p, kparams, *, tile_rows, nsplit,
                       steps_per_split, batch, feat, single_buffer, vmem_limit):
    w1a, w1b, b1, w2, b2, w3, b3 = kparams
    masked = (nsplit * steps_per_split * tile_rows != batch)
    kernel = functools.partial(
        _attn_weights_kernel, batch=batch, tile_rows=tile_rows,
        steps_per_split=steps_per_split, masked=masked)
    data_spec = pl.BlockSpec(
        (tile_rows, feat), lambda c, j: (c * steps_per_split + j, 0))
    in_specs = [data_spec, data_spec] + [
        _const_spec(a.shape, single_buffer) for a in kparams]
    return pl.pallas_call(
        kernel,
        out_shape=jax.ShapeDtypeStruct((nsplit, 128), jnp.float32),
        grid_spec=pltpu.PrefetchScalarGridSpec(
            num_scalar_prefetch=0,
            grid=(nsplit, steps_per_split),
            in_specs=in_specs,
            out_specs=pl.BlockSpec((1, 128), lambda c, j: (c, 0)),
            scratch_shapes=[pltpu.VMEM((1, 1), jnp.float32)],
        ),
        compiler_params=pltpu.CompilerParams(
            # outer split "parallel" (v7x megacore), reduction axis "arbitrary"
            dimension_semantics=("parallel", "arbitrary"),
            vmem_limit_bytes=vmem_limit,
        ),
    )(x_p, k_p, w1a, w1b, b1, w2, b2, w3, b3)


def _attn_partial_sums_call(x_p, k_p, kparams, **kw):
    if _HAS_BUFFERED1:
        try:
            return _attn_partial_sums(x_p, k_p, kparams, single_buffer=True, **kw)
        except (TypeError, NotImplementedError, pltpu.LoweringException):
            # Only the specific Buffered(1) lowering incompatibility is caught;
            # genuine failures (VMEM OOM, shape errors, ...) propagate.
            pass
    return _attn_partial_sums(x_p, k_p, kparams, single_buffer=False, **kw)


def _phase1_tile_rows(B, D, vmem_limit, single_buffer):
    """Adaptive batch tile: fit 2 arrays x 2 buffers x TB x D f32 + bf16 casts
    + activations + (single- or double-buffered) bf16 weights in ~60% of the
    scoped VMEM budget, clamped to [8, 2048]."""
    wfactor = 1 if (single_buffer and _HAS_BUFFERED1) else 2
    weight_bytes = wfactor * (2 * (2 * D * H1P + H1P * H2P + H2P * NP)
                              + 4 * (H1P + H2P + NP))
    per_row = 20 * D + 4608
    budget = int(vmem_limit * 0.6) - weight_bytes
    tb = budget // per_row
    tb = max(8, min(2048, tb))
    return max(8, (tb // 8) * 8)


# --------------------------------------------------------------------------
# Phase 2: lane-dense elementwise apply  out = w0*x + w1*k  (w0,w1 in SMEM)
# --------------------------------------------------------------------------
def _apply_kernel(w_ref, x_ref, k_ref, o_ref):
    # w_ref lives in SMEM: two scalars; inner loop is 2 vld + fma + 1 vst.
    o_ref[...] = (w_ref[0] * x_ref[...] + w_ref[1] * k_ref[...]).astype(o_ref.dtype)


def _apply_call(wvec, x2d, k2d, tile_rows, vmem_limit):
    n_rows, lanes = x2d.shape
    grid_steps = n_rows // tile_rows
    data_spec = pl.BlockSpec((tile_rows, lanes), lambda i: (i, 0))
    return pl.pallas_call(
        _apply_kernel,
        out_shape=jax.ShapeDtypeStruct((n_rows, lanes), x2d.dtype),
        grid_spec=pltpu.PrefetchScalarGridSpec(
            num_scalar_prefetch=0,
            grid=(grid_steps,),
            in_specs=[pl.BlockSpec(memory_space=pltpu.MemorySpace.SMEM),
                      data_spec, data_spec],
            out_specs=data_spec,
        ),
        compiler_params=pltpu.CompilerParams(
            dimension_semantics=("parallel",),
            vmem_limit_bytes=vmem_limit,
        ),
    )(wvec, x2d, k2d)


def _phase2_max_rows(vmem_limit):
    # 3 arrays x 2 pipeline buffers x rows x 128 lanes x 4 B <= ~75% of limit.
    rows = (vmem_limit * 3 // 4) // (6 * 128 * 4)
    rows = min(8192, rows)
    return max(1024, (rows // 8) * 8)


def _pick_phase2_tile(n_rows, max_rows):
    if n_rows <= max_rows:
        return n_rows                       # single block == full array dims
    t = (max_rows // 8) * 8
    while t >= 256:                         # never collapse to tiny (<256) tiles
        if n_rows % t == 0:
            return t
        t -= 8
    return None


# --------------------------------------------------------------------------
# Parameter handling + forward wrapper
# --------------------------------------------------------------------------
def init_params(key, last_dim, n_num=2):
    """Unpadded f32 params, kaiming-normal-like weights, [in, out] layout."""
    ks = jax.random.split(key, 6)
    fan1 = n_num * last_dim
    w1 = jax.random.normal(ks[0], (fan1, H1), jnp.float32) * jnp.sqrt(2.0 / fan1)
    b1 = jax.random.uniform(ks[1], (H1,), jnp.float32,
                            -1.0 / jnp.sqrt(fan1), 1.0 / jnp.sqrt(fan1))
    w2 = jax.random.normal(ks[2], (H1, H2), jnp.float32) * jnp.sqrt(2.0 / H1)
    b2 = jax.random.uniform(ks[3], (H2,), jnp.float32,
                            -1.0 / jnp.sqrt(H1), 1.0 / jnp.sqrt(H1))
    w3 = jax.random.normal(ks[4], (H2, n_num), jnp.float32) * jnp.sqrt(2.0 / H2)
    b3 = jax.random.uniform(ks[5], (n_num,), jnp.float32,
                            -1.0 / jnp.sqrt(H2), 1.0 / jnp.sqrt(H2))
    return (w1, b1, w2, b2, w3, b3)


def prepare_kernel_params(params, last_dim):
    """Pad hidden dims to (512, 128, 128), split W1 into x/k halves, weights in
    bf16 (MXU-native), biases in f32.  Zero padding is exact through relu."""
    w1, b1, w2, b2, w3, b3 = params
    D = last_dim
    w1p = jnp.zeros((2 * D, H1P), jnp.float32).at[:, :H1].set(w1)
    b1p = jnp.zeros((1, H1P), jnp.float32).at[:, :H1].set(b1.reshape(1, -1))
    w2p = jnp.zeros((H1P, H2P), jnp.float32).at[:H1, :H2].set(w2)
    b2p = jnp.zeros((1, H2P), jnp.float32).at[:, :H2].set(b2.reshape(1, -1))
    w3p = jnp.zeros((H2P, NP), jnp.float32).at[:H2, :NNUM].set(w3)
    b3p = jnp.zeros((1, NP), jnp.float32).at[:, :NNUM].set(b3.reshape(1, -1))
    bf = jnp.bfloat16
    return (w1p[:D].astype(bf), w1p[D:].astype(bf), b1p,
            w2p.astype(bf), b2p, w3p.astype(bf), b3p)


def fusion_forward(x, k, params):
    """x, k: [B, D] float32; params: unpadded f32 tuple. Returns [B, D]."""
    B, D = x.shape
    kparams = prepare_kernel_params(params, D)
    vmem_limit = _vmem_limit_bytes()

    weight_bytes = 2 * (2 * D * H1P + H1P * H2P + H2P * NP) + 4 * (H1P + H2P + NP)

    # ---- small-problem fast path: one fused call, no second HBM read of x/k
    fused_bytes = (3 * 4 + 2 * 2) * B * D + 4608 * B + 2 * weight_bytes
    if B <= 4096 and fused_bytes <= min(8 * _MIB, vmem_limit // 4):
        return _fused_call(x, k, kparams, vmem_limit)

    # ---- phase 1: adaptive batch tiling + dual-TC split of the MLP sweep ----
    tile_rows = _phase1_tile_rows(B, D, vmem_limit, single_buffer=True)
    if B <= tile_rows:
        tile_rows, total_tiles = B, 1
    else:
        total_tiles = _cdiv(B, tile_rows)
    nsplit = 2 if total_tiles >= 2 else 1
    total_tiles = _round_up(total_tiles, nsplit)
    steps_per_split = total_tiles // nsplit
    pad_B = total_tiles * tile_rows
    if pad_B != B:
        pad = ((0, pad_B - B), (0, 0))
        x_p, k_p = jnp.pad(x, pad), jnp.pad(k, pad)
    else:
        x_p, k_p = x, k

    partials = _attn_partial_sums_call(
        x_p, k_p, kparams, tile_rows=tile_rows, nsplit=nsplit,
        steps_per_split=steps_per_split, batch=B, feat=D,
        vmem_limit=vmem_limit)                              # [nsplit, 128]
    w0 = jnp.sum(partials[:, 0]) * (1.0 / B)
    w1 = 1.0 - w0
    wvec = jnp.stack([w0, w1]).astype(jnp.float32)          # (2,) -> SMEM

    # ---- phase 2: lane-dense elementwise apply (2-4 MiB blocks) ----
    total = B * D
    if total % 128 == 0:
        n_rows = total // 128
        tile2 = _pick_phase2_tile(n_rows, _phase2_max_rows(vmem_limit))
        if tile2 is not None:
            x2d = x.reshape(n_rows, 128)
            k2d = k.reshape(n_rows, 128)
            out2d = _apply_call(wvec, x2d, k2d, tile2, vmem_limit)
            return out2d.reshape(B, D)
    # B*D not lane-divisible (or no divisor >= 256 rows): a single fused XLA
    # elementwise pass is already at the HBM roofline and avoids padding x/k.
    return wvec[0] * x + wvec[1] * k


# --------------------------------------------------------------------------
# Pure-JAX references for validation
# --------------------------------------------------------------------------
def reference_forward(x, k, params):
    """Exact f32 replica of the PyTorch forward."""
    w1, b1, w2, b2, w3, b3 = params
    y = jnp.concatenate([x, k], axis=1)
    h1 = jax.nn.relu(y @ w1 + b1)
    h2 = jax.nn.relu(h1 @ w2 + b2)
    s = jax.nn.sigmoid(h2 @ w3 + b3)
    attn = jax.nn.softmax(s / T, axis=1)
    w = jnp.mean(attn, axis=0)
    return w[0] * x + w[1] * k


def reference_forward_bf16(x, k, params):
    """Same math but emulating the kernel's bf16 matmul operands (f32 accum)."""
    w1, b1, w2, b2, w3, b3 = params
    bf, f32 = jnp.bfloat16, jnp.float32
    r = lambda a: a.astype(bf).astype(f32)
    y = r(jnp.concatenate([x, k], axis=1))
    h1 = jax.nn.relu(y @ r(w1) + b1)
    h2 = jax.nn.relu(r(h1) @ r(w2) + b2)
    s = jax.nn.sigmoid(r(h2) @ r(w3) + b3)
    attn = jax.nn.softmax(s / T, axis=1)
    w = jnp.mean(attn, axis=0)
    return w[0] * x + w[1] * k


def _check(out, x, k, params, tag):
    ref_bf16 = reference_forward_bf16(x, k, params)
    ref_f32 = reference_forward(x, k, params)
    assert jnp.allclose(out, ref_bf16, atol=2e-3, rtol=2e-3), \
        f"{tag}: mismatch vs bf16-emulating reference"
    # Looser vs exact f32 math: drift is confined to the two fusion weights
    # through the bf16 MXU path.
    assert jnp.allclose(out, ref_f32, atol=3e-2, rtol=3e-2), \
        f"{tag}: mismatch vs exact f32 reference"


if __name__ == "__main__":
    key = jax.random.PRNGKey(0)

    # Small test (module-sized): exercises the fused single-call fast path.
    B, D = 8, 32
    kx, kk, kp = jax.random.split(key, 3)
    x = jax.random.normal(kx, (B, D), jnp.float32)
    k = jax.random.normal(kk, (B, D), jnp.float32)
    params = init_params(kp, D, n_num=2)
    out = jax.block_until_ready(fusion_forward(x, k, params))
    assert out.shape == (B, D)
    _check(out, x, k, params, "small/fused")

    # Medium test: exercises the two-phase path (tiled MLP sweep with the
    # 2-way split + accumulator, SMEM-scalar lane-dense apply).
    B2, D2 = 4096, 256
    kx2, kk2, kp2 = jax.random.split(jax.random.PRNGKey(1), 3)
    x2 = jax.random.normal(kx2, (B2, D2), jnp.float32)
    k2 = jax.random.normal(kk2, (B2, D2), jnp.float32)
    params2 = init_params(kp2, D2, n_num=2)
    out2 = jax.block_until_ready(fusion_forward(x2, k2, params2))
    assert out2.shape == (B2, D2)
    _check(out2, x2, k2, params2, "medium/two-phase")

    print("KERNEL_OK")
</pallas_src>

<mosaic_0001>
module attributes {stable_mosaic.version = 11 : i64} {
  func.func @_fused_kernel(%arg0: i32, %arg1: memref<8x32xf32, #tpu.memory_space<vmem>>, %arg2: memref<8x32xf32, #tpu.memory_space<vmem>>, %arg3: memref<32x512xbf16, #tpu.memory_space<vmem>>, %arg4: memref<32x512xbf16, #tpu.memory_space<vmem>>, %arg5: memref<1x512xf32, #tpu.memory_space<vmem>>, %arg6: memref<512x128xbf16, #tpu.memory_space<vmem>>, %arg7: memref<1x128xf32, #tpu.memory_space<vmem>>, %arg8: memref<128x128xbf16, #tpu.memory_space<vmem>>, %arg9: memref<1x128xf32, #tpu.memory_space<vmem>>, %arg10: memref<8x32xf32, #tpu.memory_space<vmem>>) attributes {dimension_semantics = [#tpu.dimension_semantics<arbitrary>], iteration_bounds = array<i64: 1>, scalar_prefetch = 0 : i64, scratch_operands = 0 : i64, tpu.core_type = #tpu.core_type<tc>, window_params = [{pipeline_mode = #tpu.pipeline_mode<synchronous>, transform_indices = @transform_0, window_bounds = array<i64: 8, 32>}, {pipeline_mode = #tpu.pipeline_mode<synchronous>, transform_indices = @transform_1, window_bounds = array<i64: 8, 32>}, {pipeline_mode = #tpu.pipeline_mode<synchronous>, transform_indices = @transform_2, window_bounds = array<i64: 32, 512>}, {pipeline_mode = #tpu.pipeline_mode<synchronous>, transform_indices = @transform_3, window_bounds = array<i64: 32, 512>}, {pipeline_mode = #tpu.pipeline_mode<synchronous>, transform_indices = @transform_4, window_bounds = array<i64: 1, 512>}, {pipeline_mode = #tpu.pipeline_mode<synchronous>, transform_indices = @transform_5, window_bounds = array<i64: 512, 128>}, {pipeline_mode = #tpu.pipeline_mode<synchronous>, transform_indices = @transform_6, window_bounds = array<i64: 1, 128>}, {pipeline_mode = #tpu.pipeline_mode<synchronous>, transform_indices = @transform_7, window_bounds = array<i64: 128, 128>}, {pipeline_mode = #tpu.pipeline_mode<synchronous>, transform_indices = @transform_8, window_bounds = array<i64: 1, 128>}, {pipeline_mode = #tpu.pipeline_mode<synchronous>, transform_indices = @transform_9, window_bounds = array<i64: 8, 32>}]} {
    %c0 = arith.constant 0 : index
    %c0_0 = arith.constant 0 : index
    %0 = vector.load %arg1[%c0, %c0_0] : memref<8x32xf32, #tpu.memory_space<vmem>>, vector<8x32xf32>
    %c0_1 = arith.constant 0 : index
    %c0_2 = arith.constant 0 : index
    %1 = vector.load %arg2[%c0_1, %c0_2] : memref<8x32xf32, #tpu.memory_space<vmem>>, vector<8x32xf32>
    %c0_3 = arith.constant 0 : index
    %c0_4 = arith.constant 0 : index
    %2 = vector.load %arg3[%c0_3, %c0_4] : memref<32x512xbf16, #tpu.memory_space<vmem>>, vector<32x512xbf16>
    %c0_5 = arith.constant 0 : index
    %c0_6 = arith.constant 0 : index
    %3 = vector.load %arg4[%c0_5, %c0_6] : memref<32x512xbf16, #tpu.memory_space<vmem>>, vector<32x512xbf16>
    %c0_7 = arith.constant 0 : index
    %c0_8 = arith.constant 0 : index
    %4 = vector.load %arg5[%c0_7, %c0_8] : memref<1x512xf32, #tpu.memory_space<vmem>>, vector<1x512xf32>
    %c0_9 = arith.constant 0 : index
    %c0_10 = arith.constant 0 : index
    %5 = vector.load %arg6[%c0_9, %c0_10] : memref<512x128xbf16, #tpu.memory_space<vmem>>, vector<512x128xbf16>
    %c0_11 = arith.constant 0 : index
    %c0_12 = arith.constant 0 : index
    %6 = vector.load %arg7[%c0_11, %c0_12] : memref<1x128xf32, #tpu.memory_space<vmem>>, vector<1x128xf32>
    %c0_13 = arith.constant 0 : index
    %c0_14 = arith.constant 0 : index
    %7 = vector.load %arg8[%c0_13, %c0_14] : memref<128x128xbf16, #tpu.memory_space<vmem>>, vector<128x128xbf16>
    %c0_15 = arith.constant 0 : index
    %c0_16 = arith.constant 0 : index
    %8 = vector.load %arg9[%c0_15, %c0_16] : memref<1x128xf32, #tpu.memory_space<vmem>>, vector<1x128xf32>
    %9 = arith.truncf %0 : vector<8x32xf32> to vector<8x32xbf16>
    %10 = arith.truncf %1 : vector<8x32xf32> to vector<8x32xbf16>
    %cst = arith.constant dense<0.000000e+00> : vector<8x512xf32>
    %11 = tpu.matmul %9, %2, %cst {dimension_numbers = #tpu.dot_dimension_numbers<[1], [0], [0], [1], [0, 0, 1, 1], [], []>} : vector<8x32xbf16>, vector<32x512xbf16>, vector<8x512xf32> -> vector<8x512xf32>
    %cst_17 = arith.constant dense<0.000000e+00> : vector<8x512xf32>
    %12 = tpu.matmul %10, %3, %cst_17 {dimension_numbers = #tpu.dot_dimension_numbers<[1], [0], [0], [1], [0, 0, 1, 1], [], []>} : vector<8x32xbf16>, vector<32x512xbf16>, vector<8x512xf32> -> vector<8x512xf32>
    %13 = arith.addf %11, %12 : vector<8x512xf32>
    %14 = vector.broadcast %4 : vector<1x512xf32> to vector<8x512xf32>
    %15 = arith.addf %13, %14 : vector<8x512xf32>
    %cst_18 = arith.constant 0.000000e+00 : f32
    %16 = vector.broadcast %cst_18 : f32 to vector<8x512xf32>
    %17 = arith.maximumf %15, %16 : vector<8x512xf32>
    %18 = arith.truncf %17 : vector<8x512xf32> to vector<8x512xbf16>
    %cst_19 = arith.constant dense<0.000000e+00> : vector<8x128xf32>
    %19 = tpu.matmul %18, %5, %cst_19 {dimension_numbers = #tpu.dot_dimension_numbers<[1], [0], [0], [1], [0, 0, 1, 1], [], []>} : vector<8x512xbf16>, vector<512x128xbf16>, vector<8x128xf32> -> vector<8x128xf32>
    %20 = vector.broadcast %6 : vector<1x128xf32> to vector<8x128xf32>
    %21 = arith.addf %19, %20 : vector<8x128xf32>
    %cst_20 = arith.constant 0.000000e+00 : f32
    %22 = vector.broadcast %cst_20 : f32 to vector<8x128xf32>
    %23 = arith.maximumf %21, %22 : vector<8x128xf32>
    %24 = arith.truncf %23 : vector<8x128xf32> to vector<8x128xbf16>
    %cst_21 = arith.constant dense<0.000000e+00> : vector<8x128xf32>
    %25 = tpu.matmul %24, %7, %cst_21 {dimension_numbers = #tpu.dot_dimension_numbers<[1], [0], [0], [1], [0, 0, 1, 1], [], []>} : vector<8x128xbf16>, vector<128x128xbf16>, vector<8x128xf32> -> vector<8x128xf32>
    %26 = vector.broadcast %8 : vector<1x128xf32> to vector<8x128xf32>
    %27 = arith.addf %25, %26 : vector<8x128xf32>
    %28 = vector.extract_strided_slice %27 {offsets = [0, 0], sizes = [8, 1], strides = [1, 1]} : vector<8x128xf32> to vector<8x1xf32>
    %29 = arith.negf %28 : vector<8x1xf32>
    %30 = math.exp %29 : vector<8x1xf32>
    %cst_22 = arith.constant 1.000000e+00 : f32
    %31 = vector.broadcast %cst_22 : f32 to vector<8x1xf32>
    %32 = arith.addf %31, %30 : vector<8x1xf32>
    %33 = arith.divf %31, %32 : vector<8x1xf32>
    %34 = vector.extract_strided_slice %27 {offsets = [0, 1], sizes = [8, 1], strides = [1, 1]} : vector<8x128xf32> to vector<8x1xf32>
    %35 = arith.negf %34 : vector<8x1xf32>
    %36 = math.exp %35 : vector<8x1xf32>
    %cst_23 = arith.constant 1.000000e+00 : f32
    %37 = vector.broadcast %cst_23 : f32 to vector<8x1xf32>
    %38 = arith.addf %37, %36 : vector<8x1xf32>
    %39 = arith.divf %37, %38 : vector<8x1xf32>
    %40 = arith.subf %33, %39 : vector<8x1xf32>
    %cst_24 = arith.constant 1.000000e-01 : f32
    %41 = vector.broadcast %cst_24 : f32 to vector<8x1xf32>
    %42 = arith.mulf %40, %41 : vector<8x1xf32>
    %43 = arith.negf %42 : vector<8x1xf32>
    %44 = math.exp %43 : vector<8x1xf32>
    %cst_25 = arith.constant 1.000000e+00 : f32
    %45 = vector.broadcast %cst_25 : f32 to vector<8x1xf32>
    %46 = arith.addf %45, %44 : vector<8x1xf32>
    %47 = arith.divf %45, %46 : vector<8x1xf32>
    %cst_26 = arith.constant dense<0.000000e+00> : vector<1xf32>
    %48 = vector.multi_reduction <add>, %47, %cst_26 [0] : vector<8x1xf32> to vector<1xf32>
    %49 = vector.shape_cast %48 : vector<1xf32> to vector<1x1xf32>
    %cst_27 = arith.constant 1.250000e-01 : f32
    %50 = vector.broadcast %cst_27 : f32 to vector<1x1xf32>
    %51 = arith.mulf %49, %50 : vector<1x1xf32>
    %cst_28 = arith.constant 1.000000e+00 : f32
    %52 = vector.broadcast %cst_28 : f32 to vector<1x1xf32>
    %53 = arith.subf %52, %51 : vector<1x1xf32>
    %54 = vector.broadcast %51 : vector<1x1xf32> to vector<8x32xf32>
    %55 = arith.mulf %54, %0 : vector<8x32xf32>
    %56 = vector.broadcast %53 : vector<1x1xf32> to vector<8x32xf32>
    %57 = arith.mulf %56, %1 : vector<8x32xf32>
    %58 = arith.addf %55, %57 : vector<8x32xf32>
    %c0_29 = arith.constant 0 : index
    %c0_30 = arith.constant 0 : index
    %59 = vector.load %arg10[%c0_29, %c0_30] : memref<8x32xf32, #tpu.memory_space<vmem>>, vector<8x32xf32>
    tpu.vector_store %arg10[%c0_29, %c0_30], %58 {strides = array<i32>} : memref<8x32xf32, #tpu.memory_space<vmem>>, vector<8x32xf32>,
    return
  }
  func.func @transform_0(%arg0: i32) -> (i32, i32) {
    %c0_i32 = arith.constant 0 : i32
    %c0_i32_0 = arith.constant 0 : i32
    %c0_i32_1 = arith.constant 0 : i32
    return %c0_i32, %c0_i32_0 : i32, i32
  }
  func.func @transform_1(%arg0: i32) -> (i32, i32) {
    %c0_i32 = arith.constant 0 : i32
    %c0_i32_0 = arith.constant 0 : i32
    %c0_i32_1 = arith.constant 0 : i32
    return %c0_i32, %c0_i32_0 : i32, i32
  }
  func.func @transform_2(%arg0: i32) -> (i32, i32) {
    %c0_i32 = arith.constant 0 : i32
    %c0_i32_0 = arith.constant 0 : i32
    %c0_i32_1 = arith.constant 0 : i32
    return %c0_i32, %c0_i32_0 : i32, i32
  }
  func.func @transform_3(%arg0: i32) -> (i32, i32) {
    %c0_i32 = arith.constant 0 : i32
    %c0_i32_0 = arith.constant 0 : i32
    %c0_i32_1 = arith.constant 0 : i32
    return %c0_i32, %c0_i32_0 : i32, i32
  }
  func.func @transform_4(%arg0: i32) -> (i32, i32) {
    %c0_i32 = arith.constant 0 : i32
    %c0_i32_0 = arith.constant 0 : i32
    %c0_i32_1 = arith.constant 0 : i32
    return %c0_i32, %c0_i32_0 : i32, i32
  }
  func.func @transform_5(%arg0: i32) -> (i32, i32) {
    %c0_i32 = arith.constant 0 : i32
    %c0_i32_0 = arith.constant 0 : i32
    %c0_i32_1 = arith.constant 0 : i32
    return %c0_i32, %c0_i32_0 : i32, i32
  }
  func.func @transform_6(%arg0: i32) -> (i32, i32) {
    %c0_i32 = arith.constant 0 : i32
    %c0_i32_0 = arith.constant 0 : i32
    %c0_i32_1 = arith.constant 0 : i32
    return %c0_i32, %c0_i32_0 : i32, i32
  }
  func.func @transform_7(%arg0: i32) -> (i32, i32) {
    %c0_i32 = arith.constant 0 : i32
    %c0_i32_0 = arith.constant 0 : i32
    %c0_i32_1 = arith.constant 0 : i32
    return %c0_i32, %c0_i32_0 : i32, i32
  }
  func.func @transform_8(%arg0: i32) -> (i32, i32) {
    %c0_i32 = arith.constant 0 : i32
    %c0_i32_0 = arith.constant 0 : i32
    %c0_i32_1 = arith.constant 0 : i32
    return %c0_i32, %c0_i32_0 : i32, i32
  }
  func.func @transform_9(%arg0: i32) -> (i32, i32) {
    %c0_i32 = arith.constant 0 : i32
    %c0_i32_0 = arith.constant 0 : i32
    %c0_i32_1 = arith.constant 0 : i32
    return %c0_i32, %c0_i32_0 : i32, i32
  }
}

</mosaic_0001>

<bundles_post_ra>
// kernel: tpu_custom_call.1
= control target key start
LH: loop header
LB: loop body
LE: loop exit
PB: predicated region body
PF: predicated region fallthrough
CT: control target
= control target key end

     0   :  { %14 = vsyncpa [#allocation3], 0  ;;  %s1511_s0 = inlined_call_operand.hbm [shape: f32[8,32], index: 0, kind: input, shape index: {}]   ;;  %s1512_s1 = inlined_call_operand.hbm [shape: f32[8,32], index: 1, kind: input, shape index: {}]   ;;  %s1513_s2 = inlined_call_operand.hbm [shape: bf16[32,512], index: 2, kind: input, shape index: {}]   ;;  %s1514_s3 = inlined_call_operand.hbm [shape: bf16[32,512], index: 3, kind: input, shape index: {}]   ;;  %s1515_s4 = inlined_call_operand.vmem [shape: f32[1,512], index: 4, kind: input, shape index: {}]   ;;  %s1516_s5 = inlined_call_operand.hbm [shape: bf16[512,128], index: 5, kind: input, shape index: {}]   ;;  %s1517_s6 = inlined_call_operand.vmem [shape: f32[1,128], index: 6, kind: input, shape index: {}]   ;;  %s1518_s7 = inlined_call_operand.hbm [shape: bf16[128,128], index: 7, kind: input, shape index: {}]   ;;  %s1519_s8 = inlined_call_operand.vmem [shape: f32[1,128], index: 8, kind: input, shape index: {}]   ;;  %s1520_s9 = inlined_call_operand.hbm [shape: f32[8,32], index: 9, kind: output, shape index: {}]  }
   0x1   :  { %15 = vsyncpa [#allocation6], 0 }
   0x2   :  { %16 = vsyncpa [#allocation9], 0 }
   0x3   :  { %17 = vsyncpa [#allocation12], 0 }
   0x4   :  { %18 = vsyncpa [#allocation4], 0  ;;  %s1323_s30 = smov [#allocation5]   ;;  %s1159_s13 = scalar_lea.hbm %s1512_s1, 128 }
   0x5   :  { %s35_s10 = sshll.u32 %s1323_s30, 4  ;;  %p1160_p0 = scmp.ne.s32.totalorder %s1512_s1, %s1159_s13  ;;  %s36_s10 = int_to_ptr.vmem [resolvable:$true] %s35_s10 }
   0x6   :  { %p1163_p1 = scmp.lt.u32.totalorder %s1159_s13, %s1512_s1 }
   0x8   :  { %p1165_p2 = pnand %p1163_p1, %p1160_p0 }
   0xa   :  { %1168 = shalt.err (!%p1165_p2)
}
   0xb   :  { %s1169_s18 = scalar_lea.vmem %s36_s10, 128  ;;  %p1174_p4 = scmp.lt.s32.totalorder %s36_s10, %s36_s10 }
   0xc   :  { %p1170_p3 = scmp.ne.s32.totalorder %s36_s10, %s1169_s18  ;;  %p1175_p5 = scmp.lt.s32.totalorder %s1169_s18, %s1169_s18 }
   0xe   :  { %p1176_p6 = por %p1175_p5, %p1174_p4 }
  0x10   :  { %p1177_p7 = pnand %p1176_p6, %p1170_p3 }
  0x12   :  { %1180 = shalt.err (!%p1177_p7)
}
  0x13   :  { %38 = dma.hbm_to_vmem [thread:$0]  %s1512_s1, 128, %s36_s10, [#allocation6]  }
  0x14   :  { %s1324_s21 = smov [#allocation8]   ;;  %s1325_s23 = smov [#allocation2]  }
  0x15   :  { %s56_s22 = sshll.u32 %s1324_s21, 4  ;;  %s25_s24 = sshll.u32 %s1325_s23, 4  ;;  %s57_s22 = int_to_ptr.vmem [resolvable:$true] %s56_s22  ;;  %s26_s24 = int_to_ptr.vmem [resolvable:$true] %s25_s24 }
  0x16   :  { %s1181_s27 = scalar_lea.hbm %s1514_s3, 1024 }
  0x17   :  { %p1182_p8 = scmp.ne.s32.totalorder %s1514_s3, %s1181_s27  ;;  %p1185_p9 = scmp.lt.u32.totalorder %s1181_s27, %s1514_s3 }
  0x19   :  { %p1187_p10 = pnand %p1185_p9, %p1182_p8 }
  0x1b   :  { %1190 = shalt.err (!%p1187_p10)
}
  0x1c   :  { %s1191_s1 = scalar_lea.vmem %s57_s22, 1024  ;;  %p1196_p12 = scmp.lt.s32.totalorder %s57_s22, %s57_s22 }
  0x1d   :  { %p1192_p11 = scmp.ne.s32.totalorder %s57_s22, %s1191_s1  ;;  %p1197_p13 = scmp.lt.s32.totalorder %s1191_s1, %s1191_s1 }
  0x1f   :  { %p1198_p0 = por %p1197_p13, %p1196_p12 }
  0x21   :  { %p1199_p1 = pnand %p1198_p0, %p1192_p11 }
  0x23   :  { %1202 = shalt.err (!%p1199_p1)
}
  0x24   :  { %s1326_s10 = smov 256   ;;  %s1327_s12 = smov 16  }
  0x25   :  { %62 = dma.hbm_to_vmem [thread:$0]  %s1514_s3, 1024, %s57_s22, [#allocation9], %s1326_s10, %s1326_s10, %s1327_s12  }
  0x26   :  { %s1203_s17 = scalar_lea.hbm %s1511_s0, 128 }
  0x27   :  { %p1204_p2 = scmp.ne.s32.totalorder %s1511_s0, %s1203_s17  ;;  %p1207_p3 = scmp.lt.u32.totalorder %s1203_s17, %s1511_s0 }
  0x29   :  { %p1209_p4 = pnand %p1207_p3, %p1204_p2 }
  0x2b   :  { %1212 = shalt.err (!%p1209_p4)
}
  0x2c   :  { %s1213_s23 = scalar_lea.vmem %s26_s24, 128  ;;  %p1218_p6 = scmp.lt.s32.totalorder %s26_s24, %s26_s24 }
  0x2d   :  { %p1214_p5 = scmp.ne.s32.totalorder %s26_s24, %s1213_s23  ;;  %p1219_p7 = scmp.lt.s32.totalorder %s1213_s23, %s1213_s23 }
  0x2f   :  { %p1220_p8 = por %p1219_p7, %p1218_p6 }
  0x31   :  { %p1221_p9 = pnand %p1220_p8, %p1214_p5 }
  0x33   :  { %1224 = shalt.err (!%p1221_p9)
}
  0x34   :  { %28 = dma.hbm_to_vmem [thread:$0]  %s1511_s0, 128, %s26_s24, [#allocation3]  }
  0x35   :  { %s1328_s25 = smov [#allocation7]   ;;  %s1329_s27 = smov [#allocation10]  }
  0x36   :  { %s44_s26 = sshll.u32 %s1328_s25, 4  ;;  %s70_s28 = sshll.u32 %s1329_s27, 4  ;;  %s45_s26 = int_to_ptr.vmem [resolvable:$true] %s44_s26  ;;  %s71_s28 = int_to_ptr.vmem [resolvable:$true] %s70_s28 }
  0x37   :  { %s1225_s11 = scalar_lea.hbm %s1513_s2, 1024 }
  0x38   :  { %p1226_p10 = scmp.ne.s32.totalorder %s1513_s2, %s1225_s11  ;;  %p1229_p11 = scmp.lt.u32.totalorder %s1225_s11, %s1513_s2 }
  0x3a   :  { %p1231_p12 = pnand %p1229_p11, %p1226_p10 }
  0x3c   :  { %1234 = shalt.err (!%p1231_p12)
}
  0x3d   :  { %s1235_s0 = scalar_lea.vmem %s45_s26, 1024  ;;  %p1240_p0 = scmp.lt.s32.totalorder %s45_s26, %s45_s26 }
  0x3e   :  { %p1236_p13 = scmp.ne.s32.totalorder %s45_s26, %s1235_s0  ;;  %p1241_p1 = scmp.lt.s32.totalorder %s1235_s0, %s1235_s0 }
  0x40   :  { %p1242_p2 = por %p1241_p1, %p1240_p0 }
  0x42   :  { %p1243_p3 = pnand %p1242_p2, %p1236_p13 }
  0x44   :  { %1246 = shalt.err (!%p1243_p3)
}
  0x45   :  { %50 = dma.hbm_to_vmem [thread:$0]  %s1513_s2, 1024, %s45_s26, [#allocation6], %s1326_s10, %s1326_s10, %s1327_s12  }
  0x46   :  { %s1247_s19 = scalar_lea.hbm %s1516_s5, 4096 }
  0x47   :  { %p1248_p4 = scmp.ne.s32.totalorder %s1516_s5, %s1247_s19  ;;  %p1251_p5 = scmp.lt.u32.totalorder %s1247_s19, %s1516_s5 }
  0x49   :  { %p1253_p6 = pnand %p1251_p5, %p1248_p4 }
  0x4b   :  { %1256 = shalt.err (!%p1253_p6)
}
  0x4c   :  { %s1257_s22 = scalar_lea.vmem %s71_s28, 4096  ;;  %p1262_p8 = scmp.lt.s32.totalorder %s71_s28, %s71_s28 }
  0x4d   :  { %p1258_p7 = scmp.ne.s32.totalorder %s71_s28, %s1257_s22  ;;  %p1263_p9 = scmp.lt.s32.totalorder %s1257_s22, %s1257_s22 }
  0x4f   :  { %p1264_p10 = por %p1263_p9, %p1262_p8 }
  0x51   :  { %p1265_p11 = pnand %p1264_p10, %p1258_p7 }
  0x53   :  { %1268 = shalt.err (!%p1265_p11)
}
  0x54   :  { %s1330_s2 = smov 64   ;;  %s1331_s10 = smov 4  }
  0x55   :  { %76 = dma.hbm_to_vmem [thread:$0]  %s1516_s5, 4096, %s71_s28, [#allocation9], %s1330_s2, %s1330_s2, %s1331_s10  }
  0x56   :  { %s1332_s26 = smov [#allocation11]   ;;  %s1269_s11 = scalar_lea.hbm %s1518_s7, 1024 }
  0x57   :  { %s84_s27 = sshll.u32 %s1332_s26, 4  ;;  %p1270_p12 = scmp.ne.s32.totalorder %s1518_s7, %s1269_s11  ;;  %s85_s27 = int_to_ptr.vmem [resolvable:$true] %s84_s27 }
  0x58   :  { %p1273_p13 = scmp.lt.u32.totalorder %s1269_s11, %s1518_s7 }
  0x5a   :  { %p1275_p0 = pnand %p1273_p13, %p1270_p12 }
  0x5c   :  { %1278 = shalt.err (!%p1275_p0)
}
  0x5d   :  { %s1279_s0 = scalar_lea.vmem %s85_s27, 1024  ;;  %p1284_p2 = scmp.lt.s32.totalorder %s85_s27, %s85_s27 }
  0x5e   :  { %p1280_p1 = scmp.ne.s32.totalorder %s85_s27, %s1279_s0  ;;  %p1285_p3 = scmp.lt.s32.totalorder %s1279_s0, %s1279_s0 }
  0x60   :  { %p1286_p4 = por %p1285_p3, %p1284_p2 }
  0x62   :  { %p1287_p5 = pnand %p1286_p4, %p1280_p1 }
  0x64   :  { %1290 = shalt.err (!%p1287_p5)
}
  0x65   :  { %90 = dma.hbm_to_vmem [thread:$0]  %s1518_s7, 1024, %s85_s27, [#allocation12], %s1330_s2, %s1330_s2, %s1331_s10  }
  0x66   :  { %1313 = dma.done.wait [#allocation3], 128  }
  0x67   :  { %1314 = vsyncadd [#allocation3], 4294967168 }
  0x68   :  { %1315 = dma.done.wait [#allocation6], 1152  }
  0x69   :  { %1316 = vsyncadd [#allocation6], 4294966144 }
  0x6a   :  { %1317 = dma.done.wait [#allocation9], 5120  }
  0x6b   :  { %1318 = vsyncadd [#allocation9], 4294962176 }
  0x6c   :  { %1319 = dma.done.wait [#allocation12], 1024  }
  0x6d   :  { %1320 = vsyncadd [#allocation12], 4294966272  ;;  %v1333_v0 = vmov 0   ;;  %v1087_v1 = vld [vmem:[#allocation8 + $0x4] ss:$16 sps:$4 sm:$0xff]   ;;  %v1466_v5 = vld [vmem:[#allocation5] sm:$0xff]  ;;  %v467_v58 = vlaneseq }
  0x6e   :  { %291 = vmatprep.mubr.bf16.mxu1 %v1333_v0  ;;  %1085 = vset.pattern.permute.xlu0 %v1333_v0  ;;  %v1089_v2 = vld [vmem:[#allocation8] ss:$16 sps:$4 sm:$0xff]   ;;  %v1090_v3 = vld [vmem:[#allocation8 + $0x24] ss:$16 sps:$4 sm:$0xff]   ;;  %v1095_v6 = vld [vmem:[#allocation8 + $0xc] ss:$16 sps:$4 sm:$0xff]   ;;  %v214_v7 = vpack.c.bf16 %v1466_v5, %v1466_v5 }
  0x6f   :  { %1086 = vset.pattern.permute.xlu1 %v1333_v0  ;;  %259 = vmatprep.subr.bf16.mxu1 %v1087_v1  ;;  %v1092_v4 = vld [vmem:[#allocation8 + $0x20] ss:$16 sps:$4 sm:$0xff]   ;;  %vm255_vm0 = vcmask 261120   ;;  %v1093_v8 = vld [vmem:[#allocation8 + $0x8] ss:$16 sps:$4 sm:$0xff]   ;;  %v1334_v53 = vmov 0.0  }
  0x70   :  { %260 = vmatpush1.bf16.msra.mxu1 %v1089_v2  ;;  %v1098_v9 = vld [vmem:[#allocation8 + $0x2c] ss:$16 sps:$4 sm:$0xff]   ;;  %v1096_v10 = vld [vmem:[#allocation8 + $0x28] ss:$16 sps:$4 sm:$0xff]   ;;  %v1101_v11 = vld [vmem:[#allocation7 + $0x4] ss:$16 sps:$4 sm:$0xff]  }
  0x71   :  { %261 = vmatprep.subr.bf16.mxu1 %v1090_v3  ;;  %v1111_v12 = vld [vmem:[#allocation10 + $0x40] sm:$0xff]   ;;  %v1113_v16 = vld [vmem:[#allocation10 + $0x48] sm:$0xff]   ;;  %v1471_v18 = vld [vmem:[#allocation2] sm:$0xff]  ;;  %v468_v59 = vshrl.u32 %v467_v58, 7  ;;  %vm1335_vm1 = vmmov 0   ;;  %vm891_vm2 = vcmask 7168  }
  0x72   :  { %v1099_v13 = vld [vmem:[#allocation7] ss:$16 sps:$4 sm:$0xff]   ;;  %v1104_v15 = vld [vmem:[#allocation7 + $0x24] ss:$16 sps:$4 sm:$0xff]   ;;  %997 = vmatprep.subr.bf16.mxu0 %v1111_v12  ;;  %v1107_v19 = vld [vmem:[#allocation7 + $0xc] ss:$16 sps:$4 sm:$0xff]   ;;  %v213_v21 = vpack.c.bf16 %v1471_v18, %v1471_v18 }
  0x73   :  { %v1112_v14 = vld [vmem:[#allocation10] sm:$0xff]   ;;  %v1105_v20 = vld [vmem:[#allocation7 + $0x8] ss:$16 sps:$4 sm:$0xff]   ;;  %v1110_v22 = vld [vmem:[#allocation7 + $0x2c] ss:$16 sps:$4 sm:$0xff]   ;;  %v473_v2 = vsub.s32 1, %v468_v59 }
  0x74   :  { %262 = vmatpush1.bf16.msra.mxu1 %v1092_v4  ;;  %998 = vmatpush3.bf16.msra.mxu0 %v1112_v14  ;;  %v1102_v17 = vld [vmem:[#allocation7 + $0x20] ss:$16 sps:$4 sm:$0xff]   ;;  %v1108_v23 = vld [vmem:[#allocation7 + $0x28] ss:$16 sps:$4 sm:$0xff]   ;;  %v481_v14 = vsub.s32 3, %v468_v59 }
  0x75   :  { %300 = vmatprep.subr.bf16.mxu1 %v1095_v6  ;;  %999 = vmatprep.subr.bf16.mxu0 %v1113_v16  ;;  %v1114_v24 = vld [vmem:[#allocation10 + $0x8] sm:$0xff]   ;;  %v1115_v25 = vld [vmem:[#allocation10 + $0x50] sm:$0xff]   ;;  %v1116_v26 = vld [vmem:[#allocation10 + $0xc0] sm:$0xff]  }
  0x76   :  { %v1117_v27 = vld [vmem:[#allocation10 + $0x10] sm:$0xff]   ;;  %v1118_v28 = vld [vmem:[#allocation10 + $0x80] sm:$0xff]   ;;  %v1119_v29 = vld [vmem:[#allocation10 + $0x58] sm:$0xff]  }
  0x77   :  { %941 = vmatmul.mubr.msk.bf16.vlgmr.msra.gmra.mrb[0].mxu1 %vm255_vm0, %v214_v7  ;;  %v1120_v30 = vld [vmem:[#allocation10 + $0xc8] sm:$0xff]   ;;  %v1121_v31 = vld [vmem:[#allocation10 + $0x18] sm:$0xff]   ;;  %v1123_v33 = vld [vmem:[#allocation10 + $0x60] sm:$0xff]  }
  0x78   :  { %301 = vmatpush1.bf16.msra.mxu1 %v1093_v8  ;;  %332 = vmatprep.mubr.bf16.mxu1 %v1333_v0  ;;  %v1122_v32 = vld [vmem:[#allocation10 + $0x88] sm:$0xff]   ;;  %v1124_v34 = vld [vmem:[#allocation10 + $0xd0] sm:$0xff]   ;;  %v1125_v35 = vld [vmem:[#allocation10 + $0x20] sm:$0xff]  }
  0x79   :  { %302 = vmatprep.subr.bf16.mxu1 %v1098_v9  ;;  %1000 = vmatpush3.bf16.msra.mxu0 %v1114_v24  ;;  %v1126_v36 = vld [vmem:[#allocation10 + $0x90] sm:$0xff]   ;;  %v1127_v37 = vld [vmem:[#allocation10 + $0x68] sm:$0xff]   ;;  %v1128_v38 = vld [vmem:[#allocation10 + $0xd8] sm:$0xff]  }
  0x7a   :  { %1001 = vmatprep.subr.bf16.mxu0 %v1115_v25  ;;  %v1129_v39 = vld [vmem:[#allocation10 + $0x28] sm:$0xff]   ;;  %v1130_v40 = vld [vmem:[#allocation10 + $0x98] sm:$0xff]   ;;  %v1131_v41 = vld [vmem:[#allocation10 + $0x70] sm:$0xff]  }
  0x7b   :  { %v1132_v42 = vld [vmem:[#allocation10 + $0xe0] sm:$0xff]   ;;  %v1133_v43 = vld [vmem:[#allocation10 + $0x30] sm:$0xff]   ;;  %v1135_v45 = vld [vmem:[#allocation10 + $0x78] sm:$0xff]  }
  0x7c   :  { %303 = vmatpush1.bf16.msra.mxu1 %v1096_v10  ;;  %v1134_v44 = vld [vmem:[#allocation10 + $0xa0] sm:$0xff]   ;;  %v1136_v46 = vld [vmem:[#allocation10 + $0xe8] sm:$0xff]   ;;  %v1137_v47 = vld [vmem:[#allocation10 + $0x38] sm:$0xff]  }
  0x7d   :  { %384 = vmatprep.subr.bf16.mxu1 %v1101_v11  ;;  %1002 = vmatpush3.bf16.msra.mxu0 %v1117_v27  ;;  %v1138_v48 = vld [vmem:[#allocation10 + $0xa8] sm:$0xff]   ;;  %v1139_v49 = vld [vmem:[#allocation10 + $0xf0] sm:$0xff]   ;;  %v1141_v51 = vld [vmem:[#allocation10 + $0xf8] sm:$0xff]  }
  0x7e   :  { %1003 = vmatprep.subr.bf16.mxu0 %v1119_v29  ;;  %v1140_v50 = vld [vmem:[#allocation10 + $0xb0] sm:$0xff]   ;;  %v1142_v52 = vld [vmem:[#allocation10 + $0xb8] sm:$0xff]  }
  0x7f   :  { %942 = vmatmul.mubr.msk.bf16.vlgmr.msra.gmra.mrb[4].mxu1 %vm255_vm0, %v214_v7  ;;  %v130_v1 = vld [vmem:[%s1515_s4] sm:$0xf] }
  0x80   :  { %385 = vmatpush1.bf16.msra.mxu1 %v1099_v13  ;;  %416 = vmatprep.mubr.bf16.mxu1 %v1333_v0  ;;  %v474_v6 = vrot.slane %v130_v1, %v473_v2  ;;  %v477_v13 = vsub.s32 2, %v468_v59 }
  0x81   :  { %386 = vmatprep.subr.bf16.mxu1 %v1104_v15  ;;  %1004 = vmatpush3.bf16.msra.mxu0 %v1121_v31 }
  0x82   :  { %1005 = vmatprep.subr.bf16.mxu0 %v1123_v33 }
  0x84   :  { %387 = vmatpush1.bf16.msra.mxu1 %v1102_v17 }
  0x85   :  { %425 = vmatprep.subr.bf16.mxu1 %v1107_v19  ;;  %1006 = vmatpush3.bf16.msra.mxu0 %v1125_v35  ;;  %v478_v19 = vrot.slane %v130_v1, %v477_v13 }
  0x86   :  { %1007 = vmatprep.subr.bf16.mxu0 %v1127_v37 }
  0x87   :  { %951 = vmatmul.mubr.msk.bf16.vlgmr.msra.gmra.mrb[8].mxu1 %vm255_vm0, %v213_v21 }
  0x88   :  { %426 = vmatpush1.bf16.msra.mxu1 %v1105_v20  ;;  %457 = vmatprep.mubr.bf16.mxu1 %v1333_v0  ;;  %v469_v0 = vsub.s32 0, %v468_v59 }
  0x89   :  { %427 = vmatprep.subr.bf16.mxu1 %v1110_v22  ;;  %1008 = vmatpush3.bf16.msra.mxu0 %v1129_v39  ;;  %v1147_v39 = vld [vmem:[#allocation11 + $0x20] sm:$0xff]  }
  0x8a   :  { %1009 = vmatprep.subr.bf16.mxu0 %v1131_v41  ;;  %v470_v3 = vrot.slane %v130_v1, %v469_v0  ;;  %v1149_v41 = vld [vmem:[#allocation11 + $0x30] sm:$0xff]  }
  0x8c   :  { %428 = vmatpush1.bf16.msra.mxu1 %v1108_v23  ;;  %v1143_v23 = vld [vmem:[#allocation11] sm:$0xff]  }
  0x8d   :  { %1019 = vmatprep.subr.bf16.mxu1 %v1116_v26  ;;  %1010 = vmatpush3.bf16.msra.mxu0 %v1133_v43 }
  0x8e   :  { %1011 = vmatprep.subr.bf16.mxu0 %v1135_v45 }
  0x8f   :  { %952 = vmatmul.mubr.msk.bf16.vlgmr.msra.gmra.mrb[12].mxu1 %vm255_vm0, %v213_v21  ;;  %v482_v21 = vrot.slane %v130_v1, %v481_v14 }
  0x90   :  { %1020 = vmatpush3.bf16.msra.mxu1 %v1118_v28 }
  0x91   :  { %1021 = vmatprep.subr.bf16.mxu1 %v1120_v30  ;;  %1012 = vmatpush3.bf16.msra.mxu0 %v1137_v47 }
  0x92   :  { %1050 = vmatprep.subr.bf16.mxu0 %v1334_v53 }
  0x94   :  { %1022 = vmatpush3.bf16.msra.mxu1 %v1122_v32  ;;  %v1144_v32 = vld [vmem:[#allocation11 + $0x8] sm:$0xff]  }
  0x95   :  { %1023 = vmatprep.subr.bf16.mxu1 %v1124_v34 }
  0x98   :  { %1024 = vmatpush3.bf16.msra.mxu1 %v1126_v36  ;;  %v1145_v36 = vld [vmem:[#allocation11 + $0x10] sm:$0xff]  }
  0x99   :  { %1025 = vmatprep.subr.bf16.mxu1 %v1128_v38  ;;  %v1146_v38 = vld [vmem:[#allocation11 + $0x18] sm:$0xff]  }
  0x9c   :  { %1026 = vmatpush3.bf16.msra.mxu1 %v1130_v40  ;;  %v1148_v40 = vld [vmem:[#allocation11 + $0x28] sm:$0xff]  }
  0x9d   :  { %1027 = vmatprep.subr.bf16.mxu1 %v1132_v42  ;;  %v1150_v42 = vld [vmem:[#allocation11 + $0x38] sm:$0xff]  }
  0xa0   :  { %1028 = vmatpush3.bf16.msra.mxu1 %v1134_v44 }
  0xa1   :  { %1029 = vmatprep.subr.bf16.mxu1 %v1136_v46 }
  0xa4   :  { %1030 = vmatpush3.bf16.msra.mxu1 %v1138_v48  ;;  %v953_v48 = vld [vmem:[%s1517_s6] ss:$0 sm:$0xff]  ;;  %s1336_s6 = smov 127  }
  0xa5   :  { %1031 = vmatprep.subr.bf16.mxu1 %v1139_v49 }
  0xa8   :  { %1032 = vmatpush3.bf16.msra.mxu1 %v1140_v50 }
  0xa9   :  { %1033 = vmatprep.subr.bf16.mxu1 %v1141_v51 }
  0xac   :  { %1034 = vmatpush3.bf16.msra.mxu1 %v1142_v52 }
 0x14a   :  { %v293_v54 = vpop.f32.mrb[0].mxu1 }
 0x14b   :  { %v295_v55 = vpop.f32.mrb[1].mxu1 }
 0x14c   :  { %v297_v56 = vpop.f32.mrb[2].mxu1 }
 0x14d   :  { %v298_v57 = vpop.f32.mrb[3].mxu1 }
 0x152   :  { %v334_v60 = vpop.f32.mrb[4].mxu1 }
 0x153   :  { %v336_v61 = vpop.f32.mrb[5].mxu1 }
 0x154   :  { %v338_v62 = vpop.f32.mrb[6].mxu1 }
 0x155   :  { %v339_v63 = vpop.f32.mrb[7].mxu1 }
 0x15a   :  { %v418_v4 = vpop.f32.mrb[8].mxu1 }
 0x15b   :  { %v419_v7 = vadd.f32 %v418_v4, %v293_v54  ;;  %v420_v8 = vpop.f32.mrb[9].mxu1 }
 0x15c   :  { %v421_v9 = vadd.f32 %v420_v8, %v295_v55  ;;  %v422_v10 = vpop.f32.mrb[10].mxu1 }
 0x15d   :  { %v487_v11 = vadd.f32 %v470_v3, %v419_v7  ;;  %v423_v12 = vpop.f32.mrb[11].mxu1 }
 0x15e   :  { %v488_v15 = vadd.f32 %v474_v6, %v421_v9 }
 0x15f   :  { %v491_v16 = vmax.f32 %v487_v11, 0.0 }
 0x160   :  { %v492_v17 = vmax.f32 %v488_v15, 0.0 }
 0x161   :  { %v495_v24 = vpack.c.bf16 %v491_v16, %v491_v16 }
 0x162   :  { %v459_v20 = vpop.f32.mrb[12].mxu1  ;;  %v496_v22 = vpack.c.bf16 %v492_v17, %v492_v17 }
 0x163   :  { %v460_v25 = vadd.f32 %v459_v20, %v334_v60  ;;  %v461_v26 = vpop.f32.mrb[13].mxu1 }
 0x164   :  { %v462_v27 = vadd.f32 %v461_v26, %v336_v61  ;;  %v463_v28 = vpop.f32.mrb[14].mxu1  ;;  %729 = vmatprep.mubr.bf16.mxu0 %v496_v22 }
 0x165   :  { %v489_v29 = vadd.f32 %v478_v19, %v460_v25  ;;  %v464_v30 = vpop.f32.mrb[15].mxu1  ;;  %730 = vmatmul.mubr.bf16.vlgmr.msra.gmra.mrb[0].mxu0 %v495_v24 }
 0x166   :  { %v490_v31 = vadd.f32 %v482_v21, %v462_v27  ;;  %1051 = vmatpush3.bf16.msra.mxu0 %v1143_v23  ;;  %1066 = vmatprep.mubr.msk.bf16.mxu0 %vm1335_vm1, %v1334_v53 }
 0x167   :  { %v493_v33 = vmax.f32 %v489_v29, 0.0  ;;  %1052 = vmatprep.subr.bf16.mxu0 %v1334_v53 }
 0x168   :  { %v494_v34 = vmax.f32 %v490_v31, 0.0 }
 0x169   :  { %v497_v37 = vpack.c.bf16 %v493_v33, %v493_v33 }
 0x16a   :  { %v498_v35 = vpack.c.bf16 %v494_v34, %v494_v34  ;;  %1053 = vmatpush3.bf16.msra.mxu0 %v1144_v32 }
 0x16b   :  { %1054 = vmatprep.subr.bf16.mxu0 %v1334_v53 }
 0x16c   :  { %769 = vmatprep.mubr.bf16.mxu1 %v498_v35 }
 0x16d   :  { %770 = vmatmul.mubr.bf16.vlgmr.msra.gmra.mrb[16].mxu1 %v497_v37 }
 0x16e   :  { %1055 = vmatpush3.bf16.msra.mxu0 %v1145_v36 }
 0x16f   :  { %1056 = vmatprep.subr.bf16.mxu0 %v1334_v53 }
 0x172   :  { %1057 = vmatpush3.bf16.msra.mxu0 %v1146_v38 }
 0x173   :  { %1058 = vmatprep.subr.bf16.mxu0 %v1334_v53 }
 0x176   :  { %1059 = vmatpush3.bf16.msra.mxu0 %v1147_v39 }
 0x177   :  { %1060 = vmatprep.subr.bf16.mxu0 %v1334_v53 }
 0x17a   :  { %1061 = vmatpush3.bf16.msra.mxu0 %v1148_v40 }
 0x17b   :  { %1062 = vmatprep.subr.bf16.mxu0 %v1334_v53 }
 0x17e   :  { %1063 = vmatpush3.bf16.msra.mxu0 %v1149_v41 }
 0x17f   :  { %1064 = vmatprep.subr.bf16.mxu0 %v1334_v53  ;;  %v986_v53 = vld [vmem:[%s1519_s8] ss:$0 sm:$0xff]  ;;  %s1337_s8 = smov [#allocation13]  }
 0x180   :  { %s921_s19 = sshll.u32 %s1337_s8, 4  ;;  %s922_s19 = int_to_ptr.vmem [resolvable:$true] %s921_s19 }
 0x181   :  { %s1291_s20 = scalar_lea.vmem %s922_s19, 128  ;;  %p1296_p7 = scmp.lt.s32.totalorder %s922_s19, %s922_s19 }
 0x182   :  { %1065 = vmatpush3.bf16.msra.mxu0 %v1150_v42  ;;  %p1292_p6 = scmp.ne.s32.totalorder %s922_s19, %s1291_s20  ;;  %p1297_p8 = scmp.lt.s32.totalorder %s1291_s20, %s1291_s20 }
 0x184   :  { %p1298_p9 = por %p1297_p8, %p1296_p7 }
 0x186   :  { %p1299_p10 = pnand %p1298_p9, %p1292_p6 }
 0x238   :  { %v1013_v43 = vpop.f32.mrb[0].mxu0 }
 0x239   :  { %v1014_v44 = vpop.f32.mrb[1].mxu0 }
 0x23a   :  { %v1015_v45 = vadd.f32 %v1014_v44, %v1013_v43  ;;  %v1016_v46 = vpop.f32.mrb[2].mxu0 }
 0x23b   :  { %v1017_v47 = vpop.f32.mrb[3].mxu0 }
 0x23c   :  { %v732_v51 = vadd.f32 %v1015_v45, %v953_v48 }
 0x240   :  { %v1035_v49 = vpop.f32.mrb[16].mxu1 }
 0x241   :  { %v1036_v50 = vpop.f32.mrb[17].mxu1 }
 0x242   :  { %v1037_v52 = vadd.f32 %v1036_v50, %v1035_v49  ;;  %v1038_v54 = vpop.f32.mrb[18].mxu1 }
 0x243   :  { %v1039_v55 = vpop.f32.mrb[19].mxu1 }
 0x244   :  { %v772_v56 = vadd.f32 %v1037_v52, %v732_v51 }
 0x246   :  { %v777_v57 = vmax.f32 %v772_v56, 0.0 }
 0x248   :  { %v778_v58 = vpack.c.bf16 %v777_v57, %v777_v57 }
 0x24a   :  { %1067 = vmatmul.mubr.bf16.vlgmr.msra.gmra.mrb[4].mxu0 %v778_v58 }
 0x31d   :  { %v867_v59 = vpop.f32.mrb[4].mxu0 }
 0x31e   :  { %v868_v60 = vadd.f32 %v986_v53, %v867_v59  ;;  %v1068_v61 = vpop.f32.mrb[5].mxu0 }
 0x31f   :  { %v870_v62 = vpop.f32.mrb[6].mxu0 }
 0x320   :  { %v995_v63 = vmul.f32 -1.442695, %v868_v60  ;;  %v1069_v0 = vpop.f32.mrb[7].mxu0 }
 0x322   :  { %1151 = vpow2.f32 %v995_v63 }
 0x32c   :  { %v1152_v1 = vpop.eup %1151 }
 0x32d   :  { %v876_v2 = vadd.f32 1.0, %v1152_v1 }
 0x32f   :  { %1153 = vrcp.f32 %v876_v2 }
 0x339   :  { %v1154_v3 = vpop.eup %1153 }
 0x33a   :  { %880 = vrot.lane.b32.xlu0 %v1154_v3, %s1336_s6 }
 0x3ac   :  { %v881_v4 = vpop.permute.xlu0 %880 }
 0x3ad   :  { %v883_v6 = vsub.f32 %v1154_v3, %v881_v4 }
 0x3af   :  { %v996_v7 = vmul.f32 -0.1, %v883_v6 }
 0x3b1   :  { %v886_v8 = vmul.f32 1.442695, %v996_v7 }
 0x3b3   :  { %1155 = vpow2.f32 %v886_v8 }
 0x3bd   :  { %v1156_v9 = vpop.eup %1155 }
 0x3be   :  { %v888_v10 = vadd.f32 1.0, %v1156_v9 }
 0x3c0   :  { %1157 = vrcp.f32 %v888_v10 }
 0x3ca   :  { %v1158_v11 = vpop.eup %1157 }
 0x3cb   :  { %v892_v12 = vsel %vm891_vm2, %v1158_v11, 0.0 }
 0x3cc   :  { %v893_v13 = vrot.slane %v892_v12, 4 }
 0x3ce   :  { %v894_v14 = vadd.f32 %v893_v13, %v892_v12 }
 0x3d0   :  { %v895_v15 = vrot.slane %v894_v14, 2 }
 0x3d2   :  { %v896_v16 = vadd.f32 %v895_v15, %v894_v14 }
 0x3d4   :  { %v897_v17 = vrot.slane %v896_v16, 1 }
 0x3d6   :  { %v898_v19 = vadd.f32 %v897_v17, %v896_v16 }
 0x3d8   :  { %v899_v20 = vmul.f32 0.125, %v898_v19 }
 0x3da   :  { %903 = vperm.xlu0 %1085, %v899_v20   ;;  %v900_v21 = vsub.f32 1.0, %v899_v20 }
 0x3dc   :  { %909 = vperm.xlu1 %1086, %v900_v21  }
 0x459   :  { %v904_v22 = vpop.permute.xlu0 %903 }
 0x45a   :  { %v906_v24 = vmul.f32 %v904_v22, %v1471_v18 }
 0x45b   :  { %v910_v23 = vpop.permute.xlu1 %909 }
 0x45c   :  { %v912_v25 = vmul.f32 %v910_v23, %v1466_v5 }
 0x45e   :  { %v913_v26 = vadd.f32 %v912_v25, %v906_v24 }
 0x460   :  { %914 = vst.msk [vmem:[#allocation13] sm:$0xff] %vm255_vm0, %v913_v26 }
 0x461   :  { %1302 = shalt.err (!%p1299_p10)
}
 0x462   :  { %s1303_s3 = scalar_lea.hbm %s1520_s9, 128 }
 0x463   :  { %p1304_p11 = scmp.ne.s32.totalorder %s1520_s9, %s1303_s3  ;;  %p1307_p12 = scmp.lt.u32.totalorder %s1303_s3, %s1520_s9 }
 0x465   :  { %p1309_p13 = pnand %p1307_p12, %p1304_p11 }
 0x467   :  { %1312 = shalt.err (!%p1309_p13)
}
 0x468   :  { %924 = dma.vmem_to_hbm [thread:$0]  %s922_s19, 128, %s1520_s9, [#allocation4]  }
 0x469   :  { %1321 = dma.done.wait [#allocation4], 128  }
 0x46a   :  { %1322 = vsyncadd [#allocation4], 4294967168 }
 0x46b   :  { %928 = vsyncpa [#allocation3], 1 }
 0x46c   :  { %929 = vsyncpa [#allocation6], 1 }
 0x46d   :  { %930 = vsyncpa [#allocation9], 1 }
 0x46e   :  { %931 = vsyncpa [#allocation12], 1 }
 0x46f   :  { %932 = vsyncpa [#allocation4], 1 }

</bundles_post_ra>
